<compile_context>
chip_gen: v6e
topology: v6e:2x2x1
jax: 0.10.0
libtpu: 0.0.40
codegen_flags: <defaults>
</compile_context>

<pallas_src>
import functools

import jax
import jax.numpy as jnp
from jax import lax
from jax.experimental import pallas as pl
from jax.experimental.pallas import tpu as pltpu

_TARGET_BLOCK_BYTES = 4 * 1024 * 1024   # per x block; x2 for double buffering


def _abs_pow(x, p):
    """|x|**p with cheap VPU paths for integer p (avoids EUP exp/log pow)."""
    if p == 2.0:
        return x * x
    if float(p).is_integer():
        return lax.integer_pow(jnp.abs(x), int(p))
    return jnp.abs(x) ** p          # float exponent -> EUP transcendentals


def _norm_limit_kernel(x_ref, seg_ref, o_ref, *, p, max_norm, power_norm,
                       n_valid_rows, tile_n, n_seg, n_inner):
    o = pl.program_id(0)            # outer ("parallel") row-range shard
    i = pl.program_id(1)            # inner ("arbitrary") accumulation step

    # Zero the resident (tile_n, n_seg) accumulator block at the start of the
    # inner (reduction) axis.
    @pl.when(i == 0)
    def _():
        o_ref[...] = jnp.zeros_like(o_ref)

    x = x_ref[...].astype(jnp.float32)                              # (tile_n, d_block)
    xp = _abs_pow(x, p)

    if n_seg == 1:
        # D already lies on the lane axis: plain lane reduction.
        powersum = jnp.sum(xp, axis=-1, keepdims=True)              # (tile_n, 1)
    else:
        # Lane-folded layout: segmented lane reduction on the MXU using a
        # block-diagonal ones matrix (one column per logical row segment).
        powersum = jnp.dot(xp, seg_ref[...],
                           preferred_element_type=jnp.float32)      # (tile_n, n_seg)

    if power_norm:
        norm = powersum
    elif p == 2.0:
        norm = jnp.sqrt(powersum)
    else:
        norm = powersum ** (1.0 / p)

    penalty = jnp.maximum(norm - max_norm, 0.0)

    # Mask rows past the end of the (un-padded) input. This also zeroes out
    # duplicate blocks introduced by the clamped index_map and any garbage in
    # the partially out-of-bounds tail block.
    blk = o * n_inner + i
    row_ids = lax.broadcasted_iota(jnp.int32, (tile_n, n_seg), 0)
    valid = (blk * tile_n + row_ids) < n_valid_rows
    o_ref[...] += jnp.where(valid, penalty, 0.0)


def norm_limit_regularizer_forward(
    x: jax.Array,
    *,
    p: float = 2.0,
    max_norm: float = 1.0,
    power_norm: bool = True,
    dim: int = -1,
    tile_rows=None,
) -> jax.Array:
    """Pallas implementation of NormLimitRegularizer.forward (scalar output)."""
    if x.ndim == 0:
        raise ValueError("expected at least a 1-D input")

    # Reduce over `dim`: move it to the last (lane) axis.
    axis = dim if dim >= 0 else x.ndim + dim
    if axis != x.ndim - 1:
        x = jnp.moveaxis(x, axis, -1)

    d = x.shape[-1]
    x2d = x.reshape(-1, d)                      # flatten leading dims
    n = x2d.shape[0]
    if n == 0 or d == 0:
        return jnp.float32(0.0)

    # Lane-dense fold for small D: pack k = 128 // D logical rows per lane row.
    if d < 128 and 128 % d == 0 and n % (128 // d) == 0:
        n_seg = 128 // d
        x2d = x2d.reshape(n // n_seg, n_seg * d)    # contiguous -> free reshape
    else:
        n_seg = 1
    n_rows, d_block = x2d.shape

    # Row-tile size: dtype-aware sublane multiple, ~_TARGET_BLOCK_BYTES block.
    itemsize = jnp.dtype(x2d.dtype).itemsize
    sublane = {4: 8, 2: 16, 1: 32}.get(itemsize, 8)
    tile_cap = tile_rows if tile_rows is not None else max(
        sublane, _TARGET_BLOCK_BYTES // (d_block * itemsize))
    tile_cap = max(sublane, (tile_cap // sublane) * sublane)
    tile_n = n_rows if n_rows <= tile_cap else tile_cap
    total_blocks = pl.cdiv(n_rows, tile_n)

    # Outer "parallel" axis: shard the row range across TensorCores (2 on v7x,
    # harmless on v5e/v6e); inner "arbitrary" axis accumulates.
    n_outer = 2 if total_blocks >= 2 else 1
    n_inner = pl.cdiv(total_blocks, n_outer)
    last_blk = total_blocks - 1

    # Block-diagonal ones (d_block, n_seg): column s sums lanes [s*d, (s+1)*d).
    seg_mat = (
        (jnp.arange(d_block, dtype=jnp.int32)[:, None] // d)
        == jnp.arange(n_seg, dtype=jnp.int32)[None, :]
    ).astype(jnp.float32)

    kernel = functools.partial(
        _norm_limit_kernel,
        p=float(p), max_norm=float(max_norm), power_norm=bool(power_norm),
        n_valid_rows=n_rows, tile_n=tile_n, n_seg=n_seg, n_inner=n_inner,
    )

    partials = pl.pallas_call(
        kernel,
        out_shape=jax.ShapeDtypeStruct((n_outer * tile_n, n_seg), jnp.float32),
        grid_spec=pltpu.PrefetchScalarGridSpec(
            num_scalar_prefetch=0,
            grid=(n_outer, n_inner),
            in_specs=[
                pl.BlockSpec(
                    (tile_n, d_block),
                    lambda o, i: (jnp.minimum(o * n_inner + i, last_blk), 0),
                ),
                pl.BlockSpec((d_block, n_seg), lambda o, i: (0, 0)),
            ],
            out_specs=pl.BlockSpec((tile_n, n_seg), lambda o, i: (o, 0)),
        ),
        compiler_params=pltpu.CompilerParams(
            dimension_semantics=("parallel", "arbitrary"),
            vmem_limit_bytes=32 * 1024 * 1024,
        ),
    )(x2d, seg_mat)

    # Tiny epilogue reduction of the per-core / per-row partial penalties.
    return jnp.sum(partials)


def _reference_forward(x, *, p=2.0, max_norm=1.0, power_norm=True, dim=-1):
    xf = x.astype(jnp.float32)
    powersum = jnp.sum(jnp.abs(xf) ** p, axis=dim)
    norm = powersum if power_norm else powersum ** (1.0 / p)
    return jnp.sum(jnp.maximum(norm - max_norm, 0.0))


if __name__ == "__main__":
    key = jax.random.PRNGKey(0)
    k0, k1, k2, k3 = jax.random.split(key, 4)

    # Primary case: 16 embeddings of dimension 32, module defaults.
    x0 = jax.random.normal(k0, (16, 32), dtype=jnp.float32)
    weight = jnp.float32(1.0)   # Regularizer.weight buffer, applied outside forward()

    reg = norm_limit_regularizer_forward(
        x0, p=2.0, max_norm=1.0, power_norm=True, dim=-1)
    reg = jax.block_until_ready(reg)
    term = reg * weight
    ref = _reference_forward(x0, p=2.0, max_norm=1.0, power_norm=True)
    assert jnp.allclose(term, ref, rtol=1e-4, atol=1e-4), (term, ref)

    # Multi-block grid + tail masking + 2-way outer ("parallel") split.
    x1 = jax.random.normal(k1, (68, 32), dtype=jnp.float32)
    got = jax.block_until_ready(
        norm_limit_regularizer_forward(x1, p=2.0, max_norm=1.0, tile_rows=8))
    ref1 = _reference_forward(x1, p=2.0, max_norm=1.0)
    assert jnp.allclose(got, ref1, rtol=1e-4, atol=1e-4), (got, ref1)

    # Integer p path, no lane fold (48 does not divide 128).
    x2 = jax.random.normal(k2, (12, 48), dtype=jnp.float32)
    got = jax.block_until_ready(
        norm_limit_regularizer_forward(x2, p=3.0, max_norm=2.0, power_norm=True))
    ref2 = _reference_forward(x2, p=3.0, max_norm=2.0, power_norm=True)
    assert jnp.allclose(got, ref2, rtol=1e-4, atol=1e-4), (got, ref2)

    # power_norm=False (true L2 norm) path.
    x3 = jax.random.normal(k3, (24, 32), dtype=jnp.float32)
    got = jax.block_until_ready(
        norm_limit_regularizer_forward(x3, p=2.0, max_norm=0.5, power_norm=False))
    ref3 = _reference_forward(x3, p=2.0, max_norm=0.5, power_norm=False)
    assert jnp.allclose(got, ref3, rtol=1e-4, atol=1e-4), (got, ref3)

    print("KERNEL_OK")
</pallas_src>

<mosaic_0001>
module attributes {stable_mosaic.version = 11 : i64} {
  func.func @_norm_limit_kernel(%arg0: i32, %arg1: i32, %arg2: memref<4x128xf32, #tpu.memory_space<vmem>>, %arg3: memref<128x4xf32, #tpu.memory_space<vmem>>, %arg4: memref<4x4xf32, #tpu.memory_space<vmem>>) attributes {dimension_semantics = [#tpu.dimension_semantics<parallel>, #tpu.dimension_semantics<arbitrary>], iteration_bounds = array<i64: 1, 1>, scalar_prefetch = 0 : i64, scratch_operands = 0 : i64, tpu.core_type = #tpu.core_type<tc>, window_params = [{transform_indices = @transform_0, window_bounds = array<i64: 4, 128>}, {pipeline_mode = #tpu.pipeline_mode<synchronous>, transform_indices = @transform_1, window_bounds = array<i64: 128, 4>}, {transform_indices = @transform_2, window_bounds = array<i64: 4, 4>}]} {
    %c0_i32 = arith.constant 0 : i32
    %0 = arith.cmpi eq, %arg1, %c0_i32 : i32
    %1 = arith.extui %0 : i1 to i32
    %c0_i32_0 = arith.constant 0 : i32
    %2 = arith.cmpi ne, %1, %c0_i32_0 : i32
    scf.if %2 {
      %cst_12 = arith.constant 0.000000e+00 : f32
      %24 = vector.broadcast %cst_12 : f32 to vector<4x4xf32>
      %c0_13 = arith.constant 0 : index
      %c0_14 = arith.constant 0 : index
      %25 = vector.load %arg4[%c0_13, %c0_14] : memref<4x4xf32, #tpu.memory_space<vmem>>, vector<4x4xf32>
      tpu.vector_store %arg4[%c0_13, %c0_14], %24 {strides = array<i32>} : memref<4x4xf32, #tpu.memory_space<vmem>>, vector<4x4xf32>,
    } else {
    }
    %c0 = arith.constant 0 : index
    %c0_1 = arith.constant 0 : index
    %3 = vector.load %arg2[%c0, %c0_1] : memref<4x128xf32, #tpu.memory_space<vmem>>, vector<4x128xf32>
    %4 = arith.mulf %3, %3 : vector<4x128xf32>
    %c0_2 = arith.constant 0 : index
    %c0_3 = arith.constant 0 : index
    %5 = vector.load %arg3[%c0_2, %c0_3] : memref<128x4xf32, #tpu.memory_space<vmem>>, vector<128x4xf32>
    %cst = arith.constant dense<0.000000e+00> : vector<4x4xf32>
    %6 = tpu.matmul %4, %5, %cst {dimension_numbers = #tpu.dot_dimension_numbers<[1], [0], [0], [1], [0, 0, 1, 1], [], []>} : vector<4x128xf32>, vector<128x4xf32>, vector<4x4xf32> -> vector<4x4xf32>
    %cst_4 = arith.constant 1.000000e+00 : f32
    %7 = vector.broadcast %cst_4 : f32 to vector<4x4xf32>
    %8 = arith.subf %6, %7 : vector<4x4xf32>
    %cst_5 = arith.constant 0.000000e+00 : f32
    %9 = vector.broadcast %cst_5 : f32 to vector<4x4xf32>
    %10 = arith.maximumf %8, %9 : vector<4x4xf32>
    %c1_i32 = arith.constant 1 : i32
    %11 = arith.muli %arg0, %c1_i32 : i32
    %12 = arith.addi %11, %arg1 : i32
    %13 = tpu.iota {dimensions = array<i32: 0>} : vector<4x4xi32>
    %c4_i32 = arith.constant 4 : i32
    %14 = arith.muli %12, %c4_i32 : i32
    %15 = vector.broadcast %14 : i32 to vector<4x4xi32>
    %16 = arith.addi %15, %13 : vector<4x4xi32>
    %c4_i32_6 = arith.constant 4 : i32
    %17 = vector.broadcast %c4_i32_6 : i32 to vector<4x4xi32>
    %18 = arith.cmpi slt, %16, %17 : vector<4x4xi32>
    %c0_7 = arith.constant 0 : index
    %c0_8 = arith.constant 0 : index
    %19 = vector.load %arg4[%c0_7, %c0_8] : memref<4x4xf32, #tpu.memory_space<vmem>>, vector<4x4xf32>
    %cst_9 = arith.constant 0.000000e+00 : f32
    %20 = vector.broadcast %cst_9 : f32 to vector<4x4xf32>
    %21 = arith.select %18, %10, %20 : vector<4x4xi1>, vector<4x4xf32>
    %22 = arith.addf %19, %21 : vector<4x4xf32>
    %c0_10 = arith.constant 0 : index
    %c0_11 = arith.constant 0 : index
    %23 = vector.load %arg4[%c0_10, %c0_11] : memref<4x4xf32, #tpu.memory_space<vmem>>, vector<4x4xf32>
    tpu.vector_store %arg4[%c0_10, %c0_11], %22 {strides = array<i32>} : memref<4x4xf32, #tpu.memory_space<vmem>>, vector<4x4xf32>,
    return
  }
  func.func @transform_0(%arg0: i32, %arg1: i32) -> (i32, i32) {
    %c1_i32 = arith.constant 1 : i32
    %0 = arith.muli %arg0, %c1_i32 : i32
    %1 = arith.addi %0, %arg1 : i32
    %c0_i32 = arith.constant 0 : i32
    %2 = arith.minsi %1, %c0_i32 : i32
    %c0_i32_0 = arith.constant 0 : i32
    %c0_i32_1 = arith.constant 0 : i32
    return %2, %c0_i32_0 : i32, i32
  }
  func.func @transform_1(%arg0: i32, %arg1: i32) -> (i32, i32) {
    %c0_i32 = arith.constant 0 : i32
    %c0_i32_0 = arith.constant 0 : i32
    %c0_i32_1 = arith.constant 0 : i32
    return %c0_i32, %c0_i32_0 : i32, i32
  }
  func.func @transform_2(%arg0: i32, %arg1: i32) -> (i32, i32) {
    %c0_i32 = arith.constant 0 : i32
    %c0_i32_0 = arith.constant 0 : i32
    return %arg0, %c0_i32 : i32, i32
  }
}

</mosaic_0001>

<bundles_post_ra>
// kernel: tpu_custom_call.1
= control target key start
LH: loop header
LB: loop body
LE: loop exit
PB: predicated region body
PF: predicated region fallthrough
CT: control target
= control target key end

     0   :  { %vm43_vm0 = vcmask 27648   ;;  %v245_v1 = vmov 0.0   ;;  %vm246_vm1 = vmmov 0   ;;  %s319_s0 = inlined_call_operand.vmem [shape: f32[4,128], index: 0, kind: input, shape index: {}]   ;;  %s320_s1 = inlined_call_operand.vmem [shape: f32[128,4], index: 1, kind: input, shape index: {}]   ;;  %s321_s2 = inlined_call_operand.hbm [shape: f32[4,4], index: 2, kind: output, shape index: {}]  }
   0x1   :  { %v62_v0 = vld [vmem:[%s320_s1 + $0x78] sm:$0xff]  ;;  %185 = vmatprep.subr.mxu0 %v245_v1  ;;  %v61_v2 = vld [vmem:[%s320_s1 + $0x70] sm:$0xff]  ;;  %217 = vmatprep.mubr.msk.f32.mxu0 %vm246_vm1, %v245_v1  ;;  %44 = vst.msk [vmem:[#allocation2] sm:$0xf] %vm43_vm0, %v245_v1  ;;  %v60_v3 = vld [vmem:[%s320_s1 + $0x68] sm:$0xff] }
   0x2   :  { %186 = vmatpush3.msra.mxu0 %v62_v0  ;;  %v59_v4 = vld [vmem:[%s320_s1 + $0x60] sm:$0xff] }
   0x3   :  { %187 = vmatprep.subr.mxu0 %v245_v1 }
   0x4   :  { %188 = vmatpush3.msra.mxu0 %v61_v2 }
   0x5   :  { %189 = vmatprep.subr.mxu0 %v245_v1 }
   0x6   :  { %7 = vsyncpa [#allocation3], 0  ;;  %190 = vmatpush3.msra.mxu0 %v60_v3  ;;  %v58_v5 = vld [vmem:[%s320_s1 + $0x58] sm:$0xff]  ;;  %v57_v6 = vld [vmem:[%s320_s1 + $0x50] sm:$0xff]  ;;  %v136_v19 = vlaneseq }
   0x7   :  { %191 = vmatprep.subr.mxu0 %v245_v1  ;;  %v56_v7 = vld [vmem:[%s320_s1 + $0x48] sm:$0xff]  ;;  %v55_v8 = vld [vmem:[%s320_s1 + $0x40] sm:$0xff]  ;;  %v54_v9 = vld [vmem:[%s320_s1 + $0x38] sm:$0xff] }
   0x8   :  { %192 = vmatpush3.msra.mxu0 %v59_v4  ;;  %v53_v10 = vld [vmem:[%s320_s1 + $0x30] sm:$0xff]  ;;  %v52_v11 = vld [vmem:[%s320_s1 + $0x28] sm:$0xff]  ;;  %v51_v12 = vld [vmem:[%s320_s1 + $0x20] sm:$0xff]  ;;  %v137_v20 = vshrl.u32 %v136_v19, 7 }
   0x9   :  { %193 = vmatprep.subr.mxu0 %v245_v1  ;;  %v50_v13 = vld [vmem:[%s320_s1 + $0x18] sm:$0xff]  ;;  %v49_v14 = vld [vmem:[%s320_s1 + $0x10] sm:$0xff]  ;;  %v45_v15 = vld [vmem:[%s319_s0] sm:$0xf]  ;;  %s247_s0 = smov [#allocation2]  }
   0xa   :  { %194 = vmatpush3.msra.mxu0 %v58_v5  ;;  %v48_v16 = vld [vmem:[%s320_s1 + $0x8] sm:$0xff]  ;;  %v47_v17 = vld [vmem:[%s320_s1] sm:$0xff]  ;;  %v46_v18 = vmul.f32 %v45_v15, %v45_v15  ;;  %vm141_vm2 = vcmp.lt.s32.totalorder %v137_v20, 4  ;;  %s153_s15 = sshll.u32 %s247_s0, 4  ;;  %s154_s15 = int_to_ptr.vmem [resolvable:$true] %s153_s15 }
   0xb   :  { %195 = vmatprep.subr.mxu0 %v245_v1  ;;  %v142_v25 = vld [vmem:[#allocation2] sm:$0xf]  ;;  %s223_s1 = scalar_lea.vmem %s154_s15, 64  ;;  %p228_p1 = scmp.lt.s32.totalorder %s154_s15, %s154_s15 }
   0xc   :  { %196 = vmatpush3.msra.mxu0 %v57_v6  ;;  %p224_p0 = scmp.ne.s32.totalorder %s154_s15, %s223_s1  ;;  %p229_p2 = scmp.lt.s32.totalorder %s223_s1, %s223_s1 }
   0xd   :  { %197 = vmatprep.subr.mxu0 %v245_v1 }
   0xe   :  { %198 = vmatpush3.msra.mxu0 %v56_v7  ;;  %p230_p3 = por %p229_p2, %p228_p1 }
   0xf   :  { %199 = vmatprep.subr.mxu0 %v245_v1 }
  0x10   :  { %200 = vmatpush3.msra.mxu0 %v55_v8  ;;  %p231_p4 = pnand %p230_p3, %p224_p0 }
  0x11   :  { %201 = vmatprep.subr.mxu0 %v245_v1 }
  0x12   :  { %202 = vmatpush3.msra.mxu0 %v54_v9 }
  0x13   :  { %203 = vmatprep.subr.mxu0 %v245_v1 }
  0x14   :  { %204 = vmatpush3.msra.mxu0 %v53_v10 }
  0x15   :  { %205 = vmatprep.subr.mxu0 %v245_v1 }
  0x16   :  { %206 = vmatpush3.msra.mxu0 %v52_v11 }
  0x17   :  { %207 = vmatprep.subr.mxu0 %v245_v1 }
  0x18   :  { %208 = vmatpush3.msra.mxu0 %v51_v12 }
  0x19   :  { %209 = vmatprep.subr.mxu0 %v245_v1 }
  0x1a   :  { %210 = vmatpush3.msra.mxu0 %v50_v13 }
  0x1b   :  { %211 = vmatprep.subr.mxu0 %v245_v1 }
  0x1c   :  { %212 = vmatpush3.msra.mxu0 %v49_v14 }
  0x1d   :  { %213 = vmatprep.subr.mxu0 %v245_v1 }
  0x1e   :  { %214 = vmatpush3.msra.mxu0 %v48_v16 }
  0x1f   :  { %215 = vmatprep.subr.mxu0 %v245_v1 }
  0x20   :  { %216 = vmatpush3.msra.mxu0 %v47_v17 }
  0x21   :  { %218 = vmatmul.mubr.f32.vlgmr.msra.gmra.mxu0 %v46_v18 }
  0xe1   :  { %v129_v21 = vpop.f32.mrf.mxu0 }
  0xe2   :  { %v167_v22 = vadd.f32 -1.0, %v129_v21 }
  0xe3   :  { %v219_v23 = vpop.f32.mrf.mxu0 }
  0xe4   :  { %v134_v24 = vmax.f32 %v167_v22, 0.0 }
  0xe6   :  { %v143_v26 = vsel %vm141_vm2, %v134_v24, 0.0 }
  0xe7   :  { %v144_v27 = vadd.f32 %v143_v26, %v142_v25 }
  0xe9   :  { %146 = vst.msk [vmem:[#allocation2] sm:$0xf] %vm43_vm0, %v144_v27 }
  0xea   :  { %234 = shalt.err (!%p231_p4)
}
  0xeb   :  { %156 = dma.vmem_to_hbm [thread:$0]  %s154_s15, 64, %s321_s2, [#allocation3]  }
  0xec   :  { %243 = dma.done.wait [#allocation3], 64  }
  0xed   :  { %244 = vsyncadd [#allocation3], 4294967232 }
  0xee   :  { %160 = vsyncpa [#allocation3], 1 }

</bundles_post_ra>
